<compile_context>
chip_gen: v7x
topology: tpu7x:2x2x1
jax: 0.10.0
libtpu: 0.0.40
codegen_flags: <defaults>
</compile_context>

<pallas_src>
import functools
import math

import jax
import jax.numpy as jnp
from jax.experimental import pallas as pl
from jax.experimental.pallas import tpu as pltpu


def _nsep_rnn_kernel(x_ref, h_ref,
                     w1_ref, b1_ref,
                     wi_ref, bi_ref, wh_ref, bh_ref,
                     wheads_ref, bheads_ref,
                     qsum_ref, hout_ref):
    """One row-tile of the fused forward pass."""
    rt = h_ref.shape[0]
    H = h_ref.shape[1]
    n_act = qsum_ref.shape[1]
    n_agents = wheads_ref.shape[1] // n_act - 1
    cdt = w1_ref.dtype                      # MXU operand dtype (f32 or bf16)

    x = x_ref[...]                          # (rt, e)  already in compute dtype
    h = h_ref[...]                          # (rt, H)  f32 (gate math stays f32)

    # fc1 + ReLU (f32 accumulation on the MXU)
    x1 = jnp.maximum(
        jnp.dot(x, w1_ref[...], preferred_element_type=jnp.float32) + b1_ref[...],
        0.0)

    # GRUCell with fused gate weights: 2 matmuls instead of 6. Gate order r|z|n.
    gi = jnp.dot(x1.astype(cdt), wi_ref[...],
                 preferred_element_type=jnp.float32) + bi_ref[...]
    gh = jnp.dot(h.astype(cdt), wh_ref[...],
                 preferred_element_type=jnp.float32) + bh_ref[...]
    r = jax.nn.sigmoid(gi[:, :H] + gh[:, :H])
    z = jax.nn.sigmoid(gi[:, H:2 * H] + gh[:, H:2 * H])
    n = jnp.tanh(gi[:, 2 * H:] + r * gh[:, 2 * H:])
    h_new = (1.0 - z) * n + z * h

    # fc2 + every per-agent head in a single matmul:
    #   columns [0, n_act)                           -> shared fc2 head q
    #   columns [n_act + g*n_act, n_act+(g+1)*n_act) -> agent-g head
    heads = jnp.dot(h_new.astype(cdt), wheads_ref[...],
                    preferred_element_type=jnp.float32) + bheads_ref[...]
    q = heads[:, :n_act]
    q_sep_all = heads[:, n_act:]

    # Per-row head selection. agent_id = global_row % n_agents, computed in-kernel
    # from an iota (no streamed mask). Fold the n_agents slabs with narrow
    # broadcast mul-adds (exact, VPU-only).
    row0 = pl.program_id(0) * rt
    agent_id = (jax.lax.broadcasted_iota(jnp.int32, (rt, 1), 0) + row0) % n_agents
    q_sep = (agent_id == 0).astype(jnp.float32) * q_sep_all[:, :n_act]
    for g in range(1, n_agents):
        q_sep = q_sep + ((agent_id == g).astype(jnp.float32)
                         * q_sep_all[:, g * n_act:(g + 1) * n_act])

    # q_sep*m + q_sep*(1-m) == q_sep  ->  update_metric dropped from the forward.
    qsum_ref[...] = q + 0.5 * q_sep
    hout_ref[...] = h_new


def _round_up(x, m):
    return ((x + m - 1) // m) * m


def prepare_params(params, compute_dtype=jnp.float32):
    """Fuse / re-layout per-gate and per-agent weights (do this once per model)."""
    H = params["w1"].shape[1]
    n_act = params["w2"].shape[1]
    n_agents = params["wsep"].shape[0]
    f32 = jnp.float32

    wi = jnp.concatenate([params["wir"], params["wiz"], params["win"]], axis=1)
    wh = jnp.concatenate([params["whr"], params["whz"], params["whn"]], axis=1)
    bi = jnp.concatenate([params["bir"], params["biz"], params["bin"]], axis=1)
    bh = jnp.concatenate([params["bhr"], params["bhz"], params["bhn"]], axis=1)

    wsep_cat = jnp.transpose(params["wsep"], (1, 0, 2)).reshape(H, n_agents * n_act)
    bsep_cat = params["bsep"].reshape(1, n_agents * n_act)
    wheads = jnp.concatenate([params["w2"], wsep_cat], axis=1)
    bheads = jnp.concatenate([params["b2"], bsep_cat], axis=1)

    return {
        "w1": params["w1"].astype(compute_dtype), "b1": params["b1"].astype(f32),
        "wi": wi.astype(compute_dtype), "bi": bi.astype(f32),
        "wh": wh.astype(compute_dtype), "bh": bh.astype(f32),
        "wheads": wheads.astype(compute_dtype), "bheads": bheads.astype(f32),
    }


@functools.partial(jax.jit, static_argnames=("row_tile",))
def nsep_rnn_agent_forward(prepared, inputs, hidden_state, update_metric=None,
                           *, row_tile=256):
    # update_metric only changes which terms are detached for autograd in the
    # original module; forward values are identical, so it is ignored here.
    del update_metric

    b, a, e = inputs.shape
    H = prepared["w1"].shape[1]
    n_act = prepared["wheads"].shape[1] // (a + 1)
    GA = a * n_act
    cdt = prepared["w1"].dtype
    N = b * a

    x = inputs.reshape(N, e).astype(cdt)
    h = hidden_state.reshape(N, H).astype(jnp.float32)

    # Row tiling (multiple of 8 sublanes); pad the batch so it divides evenly.
    rt = _round_up(min(row_tile, _round_up(N, 8)), 8)
    n_pad = _round_up(N, rt)
    if n_pad != N:
        pad = n_pad - N
        x = jnp.pad(x, ((0, pad), (0, 0)))
        h = jnp.pad(h, ((0, pad), (0, 0)))
    grid = (n_pad // rt,)

    # VMEM budget: resident weights + double-buffered row tiles (+ headroom),
    # capped so the same kernel fits v7x's 64 MiB per-core VMEM.
    weight_bytes = sum(int(prepared[k].size) * prepared[k].dtype.itemsize
                       for k in prepared)
    io_tile_bytes = rt * (e * x.dtype.itemsize + (H + n_act + H) * 4)
    vmem_limit = int(weight_bytes + 2 * io_tile_bytes) + (8 << 20)
    vmem_limit = min(max(vmem_limit, 16 << 20), 48 << 20)

    row_in = lambda w: pl.BlockSpec((rt, w), lambda i: (i, 0))
    resident = lambda arr: pl.BlockSpec(arr.shape, lambda i: (0, 0))

    q_pad, h_pad = pl.pallas_call(
        _nsep_rnn_kernel,
        grid=grid,
        in_specs=[
            row_in(e),                                      # x
            row_in(H),                                      # h
            resident(prepared["w1"]), resident(prepared["b1"]),
            resident(prepared["wi"]), resident(prepared["bi"]),
            resident(prepared["wh"]), resident(prepared["bh"]),
            resident(prepared["wheads"]), resident(prepared["bheads"]),
        ],
        out_specs=(row_in(n_act), row_in(H)),
        out_shape=(jax.ShapeDtypeStruct((n_pad, n_act), jnp.float32),
                   jax.ShapeDtypeStruct((n_pad, H), jnp.float32)),
        compiler_params=pltpu.CompilerParams(
            dimension_semantics=("parallel",),
            vmem_limit_bytes=vmem_limit),
    )(x, h,
      prepared["w1"], prepared["b1"],
      prepared["wi"], prepared["bi"],
      prepared["wh"], prepared["bh"],
      prepared["wheads"], prepared["bheads"])

    return q_pad[:N].reshape(b, a, n_act), h_pad[:N].reshape(b, a, H)


def reference_forward(params, inputs, hidden_state, update_metric):
    """Pure-JAX mirror of the PyTorch forward, for correctness checking."""
    b, a, e = inputs.shape
    H = params["w1"].shape[1]
    x = inputs.reshape(-1, e)
    h = hidden_state.reshape(-1, H)
    x1 = jnp.maximum(x @ params["w1"] + params["b1"], 0.0)
    r = jax.nn.sigmoid(x1 @ params["wir"] + params["bir"] + h @ params["whr"] + params["bhr"])
    z = jax.nn.sigmoid(x1 @ params["wiz"] + params["biz"] + h @ params["whz"] + params["bhz"])
    n = jnp.tanh(x1 @ params["win"] + params["bin"] + r * (h @ params["whn"] + params["bhn"]))
    h_new = (1.0 - z) * n + z * h
    q = (h_new @ params["w2"] + params["b2"]).reshape(b, a, -1)
    h_bah = h_new.reshape(b, a, H)
    q_sep = jnp.stack(
        [h_bah[:, i, :] @ params["wsep"][i] + params["bsep"][i, 0] for i in range(a)],
        axis=1)
    if update_metric is None:
        q_sum = q + 0.5 * q_sep
    else:
        m = (update_metric != 0).astype(jnp.float32)[:, :, None]
        m = jnp.broadcast_to(m, q.shape)
        q_sum = q + 0.5 * (q_sep * m + q_sep * (1.0 - m))
    return q_sum, h_bah


def init_params(key, e, H, n_act, n_agents):
    keys = iter(jax.random.split(key, 20))

    def u(shape, fan_in):
        bound = 1.0 / math.sqrt(fan_in)
        return jax.random.uniform(next(keys), shape, jnp.float32, -bound, bound)

    p = {}
    p["w1"], p["b1"] = u((e, H), e), u((1, H), e)
    for g in ("r", "z", "n"):
        p["wi" + g] = u((H, H), H)
        p["wh" + g] = u((H, H), H)
        p["bi" + g] = u((1, H), H)
        p["bh" + g] = u((1, H), H)
    p["w2"], p["b2"] = u((H, n_act), H), u((1, n_act), H)
    p["wsep"] = u((n_agents, H, n_act), H)
    p["bsep"] = u((n_agents, 1, n_act), H)
    return p


if __name__ == "__main__":
    b, n_agents, e, H, n_actions = 2, 3, 16, 32, 8

    key = jax.random.PRNGKey(0)
    kp, ki, kh, km = jax.random.split(key, 4)
    params = init_params(kp, e, H, n_actions, n_agents)

    inputs = jax.random.normal(ki, (b, n_agents, e), jnp.float32)
    hidden = jax.random.normal(kh, (b * n_agents, H), jnp.float32)
    update_metric = (jax.random.uniform(km, (b, n_agents)) > 0.5).astype(jnp.float32)

    q_exp, h_exp = reference_forward(params, inputs, hidden, update_metric)

    # f32 MXU path: fused weights must be numerically equivalent to the reference.
    prep_f32 = prepare_params(params, jnp.float32)
    q32, h32 = nsep_rnn_agent_forward(prep_f32, inputs, hidden, update_metric)
    jax.block_until_ready((q32, h32))
    assert jnp.allclose(q32, q_exp, atol=1e-5, rtol=1e-5)
    assert jnp.allclose(h32, h_exp, atol=1e-5, rtol=1e-5)

    # update_metric=None path (forward value identical by construction).
    q32n, h32n = nsep_rnn_agent_forward(prep_f32, inputs, hidden, None)
    jax.block_until_ready((q32n, h32n))
    q_expn, h_expn = reference_forward(params, inputs, hidden, None)
    assert jnp.allclose(q32n, q_expn, atol=1e-5, rtol=1e-5)
    assert jnp.allclose(h32n, h_expn, atol=1e-5, rtol=1e-5)

    # bf16-weight MXU path (f32 accumulation, f32 gate math): loose tolerance.
    prep_bf16 = prepare_params(params, jnp.bfloat16)
    qbf, hbf = nsep_rnn_agent_forward(prep_bf16, inputs, hidden, update_metric)
    jax.block_until_ready((qbf, hbf))
    assert jnp.allclose(qbf, q_exp, atol=1e-1, rtol=1e-1)
    assert jnp.allclose(hbf, h_exp, atol=1e-1, rtol=1e-1)

    print("KERNEL_OK")
</pallas_src>

<mosaic_0001>
module attributes {stable_mosaic.version = 11 : i64} {
  func.func @_nsep_rnn_kernel(%arg0: i32, %arg1: memref<8x16xf32, #tpu.memory_space<vmem>>, %arg2: memref<8x32xf32, #tpu.memory_space<vmem>>, %arg3: memref<16x32xf32, #tpu.memory_space<vmem>>, %arg4: memref<1x32xf32, #tpu.memory_space<vmem>>, %arg5: memref<32x96xf32, #tpu.memory_space<vmem>>, %arg6: memref<1x96xf32, #tpu.memory_space<vmem>>, %arg7: memref<32x96xf32, #tpu.memory_space<vmem>>, %arg8: memref<1x96xf32, #tpu.memory_space<vmem>>, %arg9: memref<32x32xf32, #tpu.memory_space<vmem>>, %arg10: memref<1x32xf32, #tpu.memory_space<vmem>>, %arg11: memref<8x8xf32, #tpu.memory_space<vmem>>, %arg12: memref<8x32xf32, #tpu.memory_space<vmem>>) attributes {dimension_semantics = [#tpu.dimension_semantics<parallel>], iteration_bounds = array<i64: 1>, scalar_prefetch = 0 : i64, scratch_operands = 0 : i64, tpu.core_type = #tpu.core_type<tc>, window_params = [{transform_indices = @transform_0, window_bounds = array<i64: 8, 16>}, {transform_indices = @transform_1, window_bounds = array<i64: 8, 32>}, {pipeline_mode = #tpu.pipeline_mode<synchronous>, transform_indices = @transform_2, window_bounds = array<i64: 16, 32>}, {pipeline_mode = #tpu.pipeline_mode<synchronous>, transform_indices = @transform_3, window_bounds = array<i64: 1, 32>}, {pipeline_mode = #tpu.pipeline_mode<synchronous>, transform_indices = @transform_4, window_bounds = array<i64: 32, 96>}, {pipeline_mode = #tpu.pipeline_mode<synchronous>, transform_indices = @transform_5, window_bounds = array<i64: 1, 96>}, {pipeline_mode = #tpu.pipeline_mode<synchronous>, transform_indices = @transform_6, window_bounds = array<i64: 32, 96>}, {pipeline_mode = #tpu.pipeline_mode<synchronous>, transform_indices = @transform_7, window_bounds = array<i64: 1, 96>}, {pipeline_mode = #tpu.pipeline_mode<synchronous>, transform_indices = @transform_8, window_bounds = array<i64: 32, 32>}, {pipeline_mode = #tpu.pipeline_mode<synchronous>, transform_indices = @transform_9, window_bounds = array<i64: 1, 32>}, {transform_indices = @transform_10, window_bounds = array<i64: 8, 8>}, {transform_indices = @transform_11, window_bounds = array<i64: 8, 32>}]} {
    %c0 = arith.constant 0 : index
    %c0_0 = arith.constant 0 : index
    %0 = vector.load %arg1[%c0, %c0_0] : memref<8x16xf32, #tpu.memory_space<vmem>>, vector<8x16xf32>
    %c0_1 = arith.constant 0 : index
    %c0_2 = arith.constant 0 : index
    %1 = vector.load %arg2[%c0_1, %c0_2] : memref<8x32xf32, #tpu.memory_space<vmem>>, vector<8x32xf32>
    %c0_3 = arith.constant 0 : index
    %c0_4 = arith.constant 0 : index
    %2 = vector.load %arg3[%c0_3, %c0_4] : memref<16x32xf32, #tpu.memory_space<vmem>>, vector<16x32xf32>
    %cst = arith.constant dense<0.000000e+00> : vector<8x32xf32>
    %3 = tpu.matmul %0, %2, %cst {dimension_numbers = #tpu.dot_dimension_numbers<[1], [0], [0], [1], [0, 0, 1, 1], [], []>} : vector<8x16xf32>, vector<16x32xf32>, vector<8x32xf32> -> vector<8x32xf32>
    %c0_5 = arith.constant 0 : index
    %c0_6 = arith.constant 0 : index
    %4 = vector.load %arg4[%c0_5, %c0_6] : memref<1x32xf32, #tpu.memory_space<vmem>>, vector<1x32xf32>
    %5 = vector.broadcast %4 : vector<1x32xf32> to vector<8x32xf32>
    %6 = arith.addf %3, %5 : vector<8x32xf32>
    %cst_7 = arith.constant 0.000000e+00 : f32
    %7 = vector.broadcast %cst_7 : f32 to vector<8x32xf32>
    %8 = arith.maximumf %6, %7 : vector<8x32xf32>
    %c0_8 = arith.constant 0 : index
    %c0_9 = arith.constant 0 : index
    %9 = vector.load %arg5[%c0_8, %c0_9] : memref<32x96xf32, #tpu.memory_space<vmem>>, vector<32x96xf32>
    %cst_10 = arith.constant dense<0.000000e+00> : vector<8x96xf32>
    %10 = tpu.matmul %8, %9, %cst_10 {dimension_numbers = #tpu.dot_dimension_numbers<[1], [0], [0], [1], [0, 0, 1, 1], [], []>} : vector<8x32xf32>, vector<32x96xf32>, vector<8x96xf32> -> vector<8x96xf32>
    %c0_11 = arith.constant 0 : index
    %c0_12 = arith.constant 0 : index
    %11 = vector.load %arg6[%c0_11, %c0_12] : memref<1x96xf32, #tpu.memory_space<vmem>>, vector<1x96xf32>
    %12 = vector.broadcast %11 : vector<1x96xf32> to vector<8x96xf32>
    %13 = arith.addf %10, %12 : vector<8x96xf32>
    %c0_13 = arith.constant 0 : index
    %c0_14 = arith.constant 0 : index
    %14 = vector.load %arg7[%c0_13, %c0_14] : memref<32x96xf32, #tpu.memory_space<vmem>>, vector<32x96xf32>
    %cst_15 = arith.constant dense<0.000000e+00> : vector<8x96xf32>
    %15 = tpu.matmul %1, %14, %cst_15 {dimension_numbers = #tpu.dot_dimension_numbers<[1], [0], [0], [1], [0, 0, 1, 1], [], []>} : vector<8x32xf32>, vector<32x96xf32>, vector<8x96xf32> -> vector<8x96xf32>
    %c0_16 = arith.constant 0 : index
    %c0_17 = arith.constant 0 : index
    %16 = vector.load %arg8[%c0_16, %c0_17] : memref<1x96xf32, #tpu.memory_space<vmem>>, vector<1x96xf32>
    %17 = vector.broadcast %16 : vector<1x96xf32> to vector<8x96xf32>
    %18 = arith.addf %15, %17 : vector<8x96xf32>
    %19 = vector.extract_strided_slice %13 {offsets = [0, 0], sizes = [8, 32], strides = [1, 1]} : vector<8x96xf32> to vector<8x32xf32>
    %20 = vector.extract_strided_slice %18 {offsets = [0, 0], sizes = [8, 32], strides = [1, 1]} : vector<8x96xf32> to vector<8x32xf32>
    %21 = arith.addf %19, %20 : vector<8x32xf32>
    %22 = arith.negf %21 : vector<8x32xf32>
    %23 = math.exp %22 : vector<8x32xf32>
    %cst_18 = arith.constant 1.000000e+00 : f32
    %24 = vector.broadcast %cst_18 : f32 to vector<8x32xf32>
    %25 = arith.addf %24, %23 : vector<8x32xf32>
    %26 = arith.divf %24, %25 : vector<8x32xf32>
    %27 = vector.extract_strided_slice %13 {offsets = [0, 32], sizes = [8, 32], strides = [1, 1]} : vector<8x96xf32> to vector<8x32xf32>
    %28 = vector.extract_strided_slice %18 {offsets = [0, 32], sizes = [8, 32], strides = [1, 1]} : vector<8x96xf32> to vector<8x32xf32>
    %29 = arith.addf %27, %28 : vector<8x32xf32>
    %30 = arith.negf %29 : vector<8x32xf32>
    %31 = math.exp %30 : vector<8x32xf32>
    %cst_19 = arith.constant 1.000000e+00 : f32
    %32 = vector.broadcast %cst_19 : f32 to vector<8x32xf32>
    %33 = arith.addf %32, %31 : vector<8x32xf32>
    %34 = arith.divf %32, %33 : vector<8x32xf32>
    %35 = vector.extract_strided_slice %13 {offsets = [0, 64], sizes = [8, 32], strides = [1, 1]} : vector<8x96xf32> to vector<8x32xf32>
    %36 = vector.extract_strided_slice %18 {offsets = [0, 64], sizes = [8, 32], strides = [1, 1]} : vector<8x96xf32> to vector<8x32xf32>
    %37 = arith.mulf %26, %36 : vector<8x32xf32>
    %38 = arith.addf %35, %37 : vector<8x32xf32>
    %39 = math.tanh %38 : vector<8x32xf32>
    %cst_20 = arith.constant 1.000000e+00 : f32
    %40 = vector.broadcast %cst_20 : f32 to vector<8x32xf32>
    %41 = arith.subf %40, %34 : vector<8x32xf32>
    %42 = arith.mulf %41, %39 : vector<8x32xf32>
    %43 = arith.mulf %34, %1 : vector<8x32xf32>
    %44 = arith.addf %42, %43 : vector<8x32xf32>
    %c0_21 = arith.constant 0 : index
    %c0_22 = arith.constant 0 : index
    %45 = vector.load %arg9[%c0_21, %c0_22] : memref<32x32xf32, #tpu.memory_space<vmem>>, vector<32x32xf32>
    %cst_23 = arith.constant dense<0.000000e+00> : vector<8x32xf32>
    %46 = tpu.matmul %44, %45, %cst_23 {dimension_numbers = #tpu.dot_dimension_numbers<[1], [0], [0], [1], [0, 0, 1, 1], [], []>} : vector<8x32xf32>, vector<32x32xf32>, vector<8x32xf32> -> vector<8x32xf32>
    %c0_24 = arith.constant 0 : index
    %c0_25 = arith.constant 0 : index
    %47 = vector.load %arg10[%c0_24, %c0_25] : memref<1x32xf32, #tpu.memory_space<vmem>>, vector<1x32xf32>
    %48 = vector.broadcast %47 : vector<1x32xf32> to vector<8x32xf32>
    %49 = arith.addf %46, %48 : vector<8x32xf32>
    %50 = vector.extract_strided_slice %49 {offsets = [0, 0], sizes = [8, 8], strides = [1, 1]} : vector<8x32xf32> to vector<8x8xf32>
    %51 = vector.extract_strided_slice %49 {offsets = [0, 8], sizes = [8, 24], strides = [1, 1]} : vector<8x32xf32> to vector<8x24xf32>
    %c8_i32 = arith.constant 8 : i32
    %52 = arith.muli %arg0, %c8_i32 : i32
    %53 = tpu.iota {dimensions = array<i32: 0>} : vector<8x1xi32>
    %54 = vector.broadcast %52 : i32 to vector<8x1xi32>
    %55 = arith.addi %53, %54 : vector<8x1xi32>
    %c3_i32 = arith.constant 3 : i32
    %c0_i32 = arith.constant 0 : i32
    %56 = arith.cmpi eq, %c3_i32, %c0_i32 : i32
    %c1_i32 = arith.constant 1 : i32
    %57 = arith.select %56, %c1_i32, %c3_i32 : i32
    %58 = vector.broadcast %57 : i32 to vector<8x1xi32>
    %59 = arith.remsi %55, %58 : vector<8x1xi32>
    %c0_i32_26 = arith.constant 0 : i32
    %60 = vector.broadcast %c0_i32_26 : i32 to vector<8x1xi32>
    %61 = arith.cmpi ne, %59, %60 : vector<8x1xi32>
    %c0_i32_27 = arith.constant 0 : i32
    %62 = vector.broadcast %c0_i32_27 : i32 to vector<8x1xi32>
    %63 = arith.cmpi slt, %59, %62 : vector<8x1xi32>
    %c0_i32_28 = arith.constant 0 : i32
    %64 = arith.cmpi slt, %57, %c0_i32_28 : i32
    %65 = vector.broadcast %64 : i1 to vector<8x1xi1>
    %66 = vector.broadcast %65 : vector<8x1xi1> to vector<8x1xi1>
    %67 = arith.xori %63, %66 : vector<8x1xi1>
    %68 = arith.andi %67, %61 : vector<8x1xi1>
    %69 = vector.broadcast %57 : i32 to vector<8x1xi32>
    %70 = arith.addi %59, %69 : vector<8x1xi32>
    %71 = arith.select %68, %70, %59 : vector<8x1xi1>, vector<8x1xi32>
    %c0_i32_29 = arith.constant 0 : i32
    %72 = vector.broadcast %c0_i32_29 : i32 to vector<8x1xi32>
    %73 = arith.cmpi eq, %71, %72 : vector<8x1xi32>
    %74 = arith.extui %73 : vector<8x1xi1> to vector<8x1xi32>
    %75 = arith.sitofp %74 : vector<8x1xi32> to vector<8x1xf32>
    %76 = vector.extract_strided_slice %51 {offsets = [0, 0], sizes = [8, 8], strides = [1, 1]} : vector<8x24xf32> to vector<8x8xf32>
    %77 = vector.broadcast %75 : vector<8x1xf32> to vector<8x8xf32>
    %78 = arith.mulf %77, %76 : vector<8x8xf32>
    %c1_i32_30 = arith.constant 1 : i32
    %79 = vector.broadcast %c1_i32_30 : i32 to vector<8x1xi32>
    %80 = arith.cmpi eq, %71, %79 : vector<8x1xi32>
    %81 = arith.extui %80 : vector<8x1xi1> to vector<8x1xi32>
    %82 = arith.sitofp %81 : vector<8x1xi32> to vector<8x1xf32>
    %83 = vector.extract_strided_slice %51 {offsets = [0, 8], sizes = [8, 8], strides = [1, 1]} : vector<8x24xf32> to vector<8x8xf32>
    %84 = vector.broadcast %82 : vector<8x1xf32> to vector<8x8xf32>
    %85 = arith.mulf %84, %83 : vector<8x8xf32>
    %86 = arith.addf %78, %85 : vector<8x8xf32>
    %c2_i32 = arith.constant 2 : i32
    %87 = vector.broadcast %c2_i32 : i32 to vector<8x1xi32>
    %88 = arith.cmpi eq, %71, %87 : vector<8x1xi32>
    %89 = arith.extui %88 : vector<8x1xi1> to vector<8x1xi32>
    %90 = arith.sitofp %89 : vector<8x1xi32> to vector<8x1xf32>
    %91 = vector.extract_strided_slice %51 {offsets = [0, 16], sizes = [8, 8], strides = [1, 1]} : vector<8x24xf32> to vector<8x8xf32>
    %92 = vector.broadcast %90 : vector<8x1xf32> to vector<8x8xf32>
    %93 = arith.mulf %92, %91 : vector<8x8xf32>
    %94 = arith.addf %86, %93 : vector<8x8xf32>
    %cst_31 = arith.constant 5.000000e-01 : f32
    %95 = vector.broadcast %cst_31 : f32 to vector<8x8xf32>
    %96 = arith.mulf %95, %94 : vector<8x8xf32>
    %97 = arith.addf %50, %96 : vector<8x8xf32>
    %c0_32 = arith.constant 0 : index
    %c0_33 = arith.constant 0 : index
    %98 = vector.load %arg11[%c0_32, %c0_33] : memref<8x8xf32, #tpu.memory_space<vmem>>, vector<8x8xf32>
    tpu.vector_store %arg11[%c0_32, %c0_33], %97 {strides = array<i32>} : memref<8x8xf32, #tpu.memory_space<vmem>>, vector<8x8xf32>,
    %c0_34 = arith.constant 0 : index
    %c0_35 = arith.constant 0 : index
    %99 = vector.load %arg12[%c0_34, %c0_35] : memref<8x32xf32, #tpu.memory_space<vmem>>, vector<8x32xf32>
    tpu.vector_store %arg12[%c0_34, %c0_35], %44 {strides = array<i32>} : memref<8x32xf32, #tpu.memory_space<vmem>>, vector<8x32xf32>,
    return
  }
  func.func @transform_0(%arg0: i32) -> (i32, i32) {
    %c0_i32 = arith.constant 0 : i32
    %c0_i32_0 = arith.constant 0 : i32
    return %arg0, %c0_i32 : i32, i32
  }
  func.func @transform_1(%arg0: i32) -> (i32, i32) {
    %c0_i32 = arith.constant 0 : i32
    %c0_i32_0 = arith.constant 0 : i32
    return %arg0, %c0_i32 : i32, i32
  }
  func.func @transform_2(%arg0: i32) -> (i32, i32) {
    %c0_i32 = arith.constant 0 : i32
    %c0_i32_0 = arith.constant 0 : i32
    %c0_i32_1 = arith.constant 0 : i32
    return %c0_i32, %c0_i32_0 : i32, i32
  }
  func.func @transform_3(%arg0: i32) -> (i32, i32) {
    %c0_i32 = arith.constant 0 : i32
    %c0_i32_0 = arith.constant 0 : i32
    %c0_i32_1 = arith.constant 0 : i32
    return %c0_i32, %c0_i32_0 : i32, i32
  }
  func.func @transform_4(%arg0: i32) -> (i32, i32) {
    %c0_i32 = arith.constant 0 : i32
    %c0_i32_0 = arith.constant 0 : i32
    %c0_i32_1 = arith.constant 0 : i32
    return %c0_i32, %c0_i32_0 : i32, i32
  }
  func.func @transform_5(%arg0: i32) -> (i32, i32) {
    %c0_i32 = arith.constant 0 : i32
    %c0_i32_0 = arith.constant 0 : i32
    %c0_i32_1 = arith.constant 0 : i32
    return %c0_i32, %c0_i32_0 : i32, i32
  }
  func.func @transform_6(%arg0: i32) -> (i32, i32) {
    %c0_i32 = arith.constant 0 : i32
    %c0_i32_0 = arith.constant 0 : i32
    %c0_i32_1 = arith.constant 0 : i32
    return %c0_i32, %c0_i32_0 : i32, i32
  }
  func.func @transform_7(%arg0: i32) -> (i32, i32) {
    %c0_i32 = arith.constant 0 : i32
    %c0_i32_0 = arith.constant 0 : i32
    %c0_i32_1 = arith.constant 0 : i32
    return %c0_i32, %c0_i32_0 : i32, i32
  }
  func.func @transform_8(%arg0: i32) -> (i32, i32) {
    %c0_i32 = arith.constant 0 : i32
    %c0_i32_0 = arith.constant 0 : i32
    %c0_i32_1 = arith.constant 0 : i32
    return %c0_i32, %c0_i32_0 : i32, i32
  }
  func.func @transform_9(%arg0: i32) -> (i32, i32) {
    %c0_i32 = arith.constant 0 : i32
    %c0_i32_0 = arith.constant 0 : i32
    %c0_i32_1 = arith.constant 0 : i32
    return %c0_i32, %c0_i32_0 : i32, i32
  }
  func.func @transform_10(%arg0: i32) -> (i32, i32) {
    %c0_i32 = arith.constant 0 : i32
    %c0_i32_0 = arith.constant 0 : i32
    return %arg0, %c0_i32 : i32, i32
  }
  func.func @transform_11(%arg0: i32) -> (i32, i32) {
    %c0_i32 = arith.constant 0 : i32
    %c0_i32_0 = arith.constant 0 : i32
    return %arg0, %c0_i32 : i32, i32
  }
}

</mosaic_0001>

<bundles_post_ra>
// kernel: nsep_rnn_agent_forward.1
= control target key start
LH: loop header
LB: loop body
LE: loop exit
PB: predicated region body
PF: predicated region fallthrough
CT: control target
= control target key end

     0   :  { %17 = vsyncpa [#allocation3], 0  ;;  %s963_s0 = inlined_call_operand.vmem [shape: f32[8,16], index: 0, kind: input, shape index: {}]   ;;  %s964_s1 = inlined_call_operand.vmem [shape: f32[8,32], index: 1, kind: input, shape index: {}]   ;;  %s965_s2 = inlined_call_operand.hbm [shape: f32[16,32], index: 2, kind: input, shape index: {}]   ;;  %s966_s3 = inlined_call_operand.vmem [shape: f32[1,32], index: 3, kind: input, shape index: {}]   ;;  %s967_s4 = inlined_call_operand.vmem [shape: f32[32,96], index: 4, kind: input, shape index: {}]   ;;  %s968_s5 = inlined_call_operand.hbm [shape: f32[1,96], index: 5, kind: input, shape index: {}]   ;;  %s969_s6 = inlined_call_operand.vmem [shape: f32[32,96], index: 6, kind: input, shape index: {}]   ;;  %s970_s7 = inlined_call_operand.hbm [shape: f32[1,96], index: 7, kind: input, shape index: {}]   ;;  %s971_s8 = inlined_call_operand.hbm [shape: f32[32,32], index: 8, kind: input, shape index: {}]   ;;  %s972_s9 = inlined_call_operand.hbm [shape: f32[1,32], index: 9, kind: input, shape index: {}]   ;;  %s973_s10 = inlined_call_operand.vmem [shape: f32[8,8], index: 10, kind: output, shape index: {0}]   ;;  %s974_s11 = inlined_call_operand.vmem [shape: f32[8,32], index: 11, kind: output, shape index: {1}]  }
   0x1   :  { %18 = vsyncpa [#allocation5], 0 }
   0x2   :  { %19 = vsyncpa [#allocation8], 0  ;;  %s763_s17 = smov [#allocation4]   ;;  %s647_s21 = scalar_lea.hbm %s968_s5, 16 }
   0x3   :  { %s46_s18 = sshll.u32 %s763_s17, 4  ;;  %p648_p0 = scmp.ne.s32.totalorder %s968_s5, %s647_s21  ;;  %s47_s18 = int_to_ptr.vmem [resolvable:$true] %s46_s18 }
   0x4   :  { %p651_p1 = scmp.lt.u32.totalorder %s647_s21, %s968_s5 }
   0x6   :  { %p653_p2 = pnand %p651_p1, %p648_p0 }
   0x8   :  { %656 = shalt.err (!%p653_p2)
}
   0x9   :  { %s657_s26 = scalar_lea.vmem %s47_s18, 16  ;;  %s661_s27 = scalar_lea.vmem %s47_s18, 32 }
   0xa   :  { %p658_p3 = scmp.ne.s32.totalorder %s47_s18, %s657_s26  ;;  %p662_p4 = scmp.lt.s32.totalorder %s47_s18, %s47_s18 }
   0xb   :  { %p663_p5 = scmp.lt.s32.totalorder %s661_s27, %s657_s26 }
   0xd   :  { %p664_p6 = por %p663_p5, %p662_p4 }
   0xf   :  { %p665_p7 = pnand %p664_p6, %p658_p3 }
  0x11   :  { %668 = shalt.err (!%p665_p7)
}
  0x12   :  { %49 = dma.hbm_to_vmem [thread:$0]  %s968_s5, 16, %s47_s18, [#allocation5]  }
  0x13   :  { %s764_s30 = smov [#allocation7]   ;;  %s765_s13 = smov [#allocation2]  }
  0x14   :  { %s67_s12 = sshll.u32 %s764_s30, 4  ;;  %s29_s14 = sshll.u32 %s765_s13, 4  ;;  %s68_s12 = int_to_ptr.vmem [resolvable:$true] %s67_s12  ;;  %s30_s14 = int_to_ptr.vmem [resolvable:$true] %s29_s14 }
  0x15   :  { %s669_s17 = scalar_lea.hbm %s971_s8, 512 }
  0x16   :  { %p670_p8 = scmp.ne.s32.totalorder %s971_s8, %s669_s17  ;;  %p673_p9 = scmp.lt.u32.totalorder %s669_s17, %s971_s8 }
  0x18   :  { %p675_p10 = pnand %p673_p9, %p670_p8 }
  0x1a   :  { %678 = shalt.err (!%p675_p10)
}
  0x1b   :  { %s679_s5 = scalar_lea.vmem %s68_s12, 512  ;;  %p684_p12 = scmp.lt.s32.totalorder %s68_s12, %s68_s12 }
  0x1c   :  { %p680_p11 = scmp.ne.s32.totalorder %s68_s12, %s679_s5  ;;  %p685_p13 = scmp.lt.s32.totalorder %s679_s5, %s679_s5 }
  0x1e   :  { %p686_p0 = por %p685_p13, %p684_p12 }
  0x20   :  { %p687_p1 = pnand %p686_p0, %p680_p11 }
  0x22   :  { %690 = shalt.err (!%p687_p1)
}
  0x23   :  { %s766_s18 = smov 128   ;;  %s767_s23 = smov 8  }
  0x24   :  { %73 = dma.hbm_to_vmem [thread:$0]  %s971_s8, 512, %s68_s12, [#allocation8], %s766_s18, %s766_s18, %s767_s23  }
  0x25   :  { %s691_s28 = scalar_lea.hbm %s965_s2, 256 }
  0x26   :  { %p692_p2 = scmp.ne.s32.totalorder %s965_s2, %s691_s28  ;;  %p695_p3 = scmp.lt.u32.totalorder %s691_s28, %s965_s2 }
  0x28   :  { %p697_p4 = pnand %p695_p3, %p692_p2 }
  0x2a   :  { %700 = shalt.err (!%p697_p4)
}
  0x2b   :  { %s701_s16 = scalar_lea.vmem %s30_s14, 256  ;;  %p706_p6 = scmp.lt.s32.totalorder %s30_s14, %s30_s14 }
  0x2c   :  { %p702_p5 = scmp.ne.s32.totalorder %s30_s14, %s701_s16  ;;  %p707_p7 = scmp.lt.s32.totalorder %s701_s16, %s701_s16 }
  0x2e   :  { %p708_p8 = por %p707_p7, %p706_p6 }
  0x30   :  { %p709_p9 = pnand %p708_p8, %p702_p5 }
  0x32   :  { %712 = shalt.err (!%p709_p9)
}
  0x33   :  { %35 = dma.hbm_to_vmem [thread:$0]  %s965_s2, 256, %s30_s14, [#allocation3], %s766_s18, %s766_s18, %s767_s23  }
  0x34   :  { %s768_s17 = smov [#allocation6]   ;;  %s769_s20 = smov [#allocation9]  }
  0x35   :  { %s58_s19 = sshll.u32 %s768_s17, 4  ;;  %s80_s21 = sshll.u32 %s769_s20, 4  ;;  %s59_s19 = int_to_ptr.vmem [resolvable:$true] %s58_s19  ;;  %s81_s21 = int_to_ptr.vmem [resolvable:$true] %s80_s21 }
  0x36   :  { %s713_s24 = scalar_lea.hbm %s970_s7, 16 }
  0x37   :  { %p714_p10 = scmp.ne.s32.totalorder %s970_s7, %s713_s24  ;;  %p717_p11 = scmp.lt.u32.totalorder %s713_s24, %s970_s7 }
  0x39   :  { %p719_p12 = pnand %p717_p11, %p714_p10 }
  0x3b   :  { %722 = shalt.err (!%p719_p12)
}
  0x3c   :  { %s723_s2 = scalar_lea.vmem %s59_s19, 16  ;;  %s727_s14 = scalar_lea.vmem %s59_s19, 32 }
  0x3d   :  { %p724_p13 = scmp.ne.s32.totalorder %s59_s19, %s723_s2  ;;  %p728_p0 = scmp.lt.s32.totalorder %s59_s19, %s59_s19 }
  0x3e   :  { %p729_p1 = scmp.lt.s32.totalorder %s727_s14, %s723_s2 }
  0x40   :  { %p730_p2 = por %p729_p1, %p728_p0 }
  0x42   :  { %p731_p3 = pnand %p730_p2, %p724_p13 }
  0x44   :  { %734 = shalt.err (!%p731_p3)
}
  0x45   :  { %61 = dma.hbm_to_vmem [thread:$0]  %s970_s7, 16, %s59_s19, [#allocation5]  }
  0x46   :  { %s735_s13 = scalar_lea.hbm %s972_s9, 16 }
  0x47   :  { %p736_p4 = scmp.ne.s32.totalorder %s972_s9, %s735_s13  ;;  %p739_p5 = scmp.lt.u32.totalorder %s735_s13, %s972_s9 }
  0x49   :  { %p741_p6 = pnand %p739_p5, %p736_p4 }
  0x4b   :  { %744 = shalt.err (!%p741_p6)
}
  0x4c   :  { %s745_s17 = scalar_lea.vmem %s81_s21, 16  ;;  %s749_s20 = scalar_lea.vmem %s81_s21, 32 }
  0x4d   :  { %p746_p7 = scmp.ne.s32.totalorder %s81_s21, %s745_s17  ;;  %p750_p8 = scmp.lt.s32.totalorder %s81_s21, %s81_s21 }
  0x4e   :  { %p751_p9 = scmp.lt.s32.totalorder %s749_s20, %s745_s17 }
  0x50   :  { %p752_p10 = por %p751_p9, %p750_p8 }
  0x52   :  { %p753_p11 = pnand %p752_p10, %p746_p7 }
  0x54   :  { %756 = shalt.err (!%p753_p11)
}
  0x55   :  { %83 = dma.hbm_to_vmem [thread:$0]  %s972_s9, 16, %s81_s21, [#allocation8]  }
  0x56   :  { %757 = dma.done.wait [#allocation3], 256  }
  0x57   :  { %758 = vsyncadd [#allocation3], 4294967040 }
  0x58   :  { %759 = dma.done.wait [#allocation5], 32  }
  0x59   :  { %760 = vsyncadd [#allocation5], 4294967264 }
  0x5a   :  { %761 = dma.done.wait [#allocation8], 528  }
  0x5b   :  { %762 = vsyncadd [#allocation8], 4294966768  ;;  %v770_v0 = vmov 0.0|0.0   ;;  %vm771_vm0 = vmmov 0   ;;  %v772_v1 = vmov 0.0   ;;  %v101_v2 = vld [vmem:[#allocation2] sm:$0xff]  ;;  %v470_v55 = vlaneseq }
  0x5c   :  { %603 = vmatprep.subr.bf16.mxu0 %v770_v0  ;;  %567 = vmatprep.mubr.msk.f32.mxu0 %vm771_vm0, %v772_v1  ;;  %v102_v3 = vld [vmem:[#allocation2 + $0x8] sm:$0xff]  ;;  %v270_v5 = vld [vmem:[%s969_s6] sm:$0xff]  ;;  %vm110_vm1 = vcmask 130048   ;;  %v272_v11 = vld [vmem:[%s969_s6 + $0x10] sm:$0xff]  ;;  %vm196_vm2 = vcmask 261120   ;;  %s777_s7 = smov 120  }
  0x5d   :  { %606 = vmatprep.subr.bf16.mxu1 %v770_v0  ;;  %578 = vmatprep.mubr.msk.f32.mxu1 %vm771_vm0, %v772_v1  ;;  %v604_v4 = vpack.c.bf16 %v102_v3, %v101_v2  ;;  %v271_v6 = vld [vmem:[%s969_s6 + $0x8] sm:$0xff]  ;;  %v185_v7 = vld [vmem:[%s967_s4] sm:$0xff]  ;;  %v273_v12 = vld [vmem:[%s969_s6 + $0x18] sm:$0xff]  ;;  %v471_v56 = vshrl.u32 %v470_v55, 7  ;;  %vm518_vm9 = vcmask 64512  }
  0x5e   :  { %v99_v8 = vld [vmem:[%s963_s0] sm:$0xff]  ;;  %v613_v9 = vpack.c.bf16 %v271_v6, %v270_v5  ;;  %v186_v10 = vld [vmem:[%s967_s4 + $0x8] sm:$0xff]  ;;  %v616_v14 = vpack.c.bf16 %v273_v12, %v272_v11  ;;  %v187_v16 = vld [vmem:[%s967_s4 + $0x10] sm:$0xff] }
  0x5f   :  { %605 = vmatpush3.bf16.msra.mxu0 %v604_v4  ;;  %v607_v13 = vpack.c.bf16 %v186_v10, %v185_v7  ;;  %v100_v15 = vld [vmem:[%s964_s1] sm:$0xff]  ;;  %v188_v17 = vld [vmem:[%s967_s4 + $0x18] sm:$0xff]  ;;  %v537_v24 = vld [vmem:[#allocation6] ss:$0 sm:$0xff]  ;;  %s773_s1 = smov 64   ;;  %s775_s4 = smov 32  }
  0x60   :  { %612 = vmatprep.subr.bf16.mxu0 %v770_v0  ;;  %v610_v18 = vpack.c.bf16 %v188_v17, %v187_v16  ;;  %v533_v19 = vld [vmem:[%s966_s3] ss:$0 sm:$0xff]  ;;  %v535_v28 = vld [vmem:[#allocation4] ss:$0 sm:$0xff]  ;;  %v383_v41 = vld [vmem:[#allocation7] sm:$0xff]  ;;  %s774_s3 = smov 96  }
  0x61   :  { %608 = vmatpush3.bf16.msra.mxu1 %v607_v13  ;;  %v384_v42 = vld [vmem:[#allocation7 + $0x8] sm:$0xff]  ;;  %v385_v43 = vld [vmem:[#allocation7 + $0x10] sm:$0xff]  ;;  %v386_v45 = vld [vmem:[#allocation7 + $0x18] sm:$0xff]  ;;  %v953_v57 = vmul.u32.u64.low 2863311531, %v471_v56  ;;  %v954_v58 = vmul.u32.u64.high 2863311531, %v471_v56, %v953_v57 }
  0x62   :  { %568 = vmatmul.mubr.msk.f32.vlgmr.msra.gmra.mrb[0].mxu0 %vm110_vm1, %v99_v8  ;;  %609 = vmatprep.subr.bf16.mxu1 %v770_v0  ;;  %v619_v44 = vpack.c.bf16 %v384_v42, %v383_v41  ;;  %v622_v46 = vpack.c.bf16 %v386_v45, %v385_v43 }
  0x63   :  { %614 = vmatpush3.bf16.msra.mxu0 %v613_v9  ;;  %589 = vmatprep.mubr.msk.f32.mxu0 %vm771_vm0, %v772_v1  ;;  %v480_v59 = vshrl.u32 %v954_v58, 1 }
  0x64   :  { %615 = vmatprep.subr.bf16.mxu0 %v770_v0 }
  0x65   :  { %611 = vmatpush3.bf16.msra.mxu1 %v610_v18  ;;  %v481_v60 = vmul.u32 3, %v480_v59 }
  0x66   :  { %618 = vmatprep.subr.bf16.mxu1 %v770_v0 }
  0x67   :  { %617 = vmatpush3.bf16.msra.mxu0 %v616_v14  ;;  %v482_v61 = vsub.s32 %v471_v56, %v481_v60 }
  0x69   :  { %vm485_vm3 = vcmp.ne.s32.totalorder %v482_v61, 0  ;;  %vm486_vm4 = vcmp.lt.s32.totalorder %v482_v61, 0  ;;  %v488_v62 = vadd.s32 3, %v482_v61 }
  0x6a   :  { %590 = vmatmul.mubr.msk.f32.vlgmr.msra.gmra.mrb[2].mxu0 %vm196_vm2, %v100_v15  ;;  %vm487_vm5 = vmand %vm486_vm4, %vm485_vm3 }
  0x6b   :  { %v489_v63 = vsel %vm487_vm5, %v488_v62, %v482_v61 }
  0x6c   :  { %vm503_vm6 = vcmp.eq.s32.totalorder %v489_v63, 2  ;;  %vm494_vm7 = vcmp.eq.s32.totalorder %v489_v63, 1  ;;  %vm490_vm8 = vcmp.eq.s32.totalorder %v489_v63, 0 }
  0x6d   :  { %v544_v3 = vsel %vm503_vm6, 1.0, %v772_v1  ;;  %v543_v4 = vsel %vm494_vm7, 1.0, %v772_v1  ;;  %v542_v9 = vsel %vm490_vm8, 1.0, %v772_v1 }
 0x135   :  { %v180_v20 = vpop.f32.mrb[0].mxu0 }
 0x136   :  { %v181_v21 = vadd.f32 %v533_v19, %v180_v20  ;;  %v569_v22 = vpop.f32.mrb[1].mxu0 }
 0x138   :  { %v184_v23 = vmax.f32 %v181_v21, 0.0 }
 0x13a   :  { %579 = vmatmul.mubr.msk.f32.vlgmr.msra.gmra.mrb[0].mxu1 %vm196_vm2, %v184_v23 }
 0x13b   :  { %600 = vmatprep.mubr.msk.f32.mxu1 %vm771_vm0, %v772_v1  ;;  %620 = vmatpush3.bf16.msra.mxu1 %v619_v44 }
 0x13c   :  { %621 = vmatprep.subr.bf16.mxu1 %v770_v0  ;;  %v540_v0 = vld [vmem:[#allocation9] ss:$0 sm:$0xff] }
 0x13d   :  { %v350_v25 = vpop.f32.mrb[2].mxu0 }
 0x13e   :  { %v351_v26 = vadd.f32 %v537_v24, %v350_v25  ;;  %v591_v27 = vpop.f32.mrb[3].mxu0 }
 0x13f   :  { %623 = vmatpush3.bf16.msra.mxu1 %v622_v46 }
 0x140   :  { %362 = vrot.lane.b32.xlu0 %v351_v26, %s773_s1 }
 0x1b2   :  { %v363_v36 = vpop.permute.xlu0 %362 }
 0x20d   :  { %v266_v29 = vpop.f32.mrb[0].mxu1 }
 0x20e   :  { %v267_v30 = vadd.f32 %v535_v28, %v266_v29  ;;  %v580_v31 = vpop.f32.mrb[1].mxu1 }
 0x210   :  { %v354_v32 = vadd.f32 %v351_v26, %v267_v30 }
 0x212   :  { %v539_v33 = vmul.f32 -1.442695, %v354_v32 }
 0x214   :  { %641 = vpow2.f32 %v539_v33 }
 0x21e   :  { %v642_v34 = vpop.eup %641 }
 0x21f   :  { %v358_v35 = vadd.f32 1.0, %v642_v34 }
 0x221   :  { %643 = vrcp.f32 %v358_v35 }
 0x22b   :  { %v644_v37 = vpop.eup %643 }
 0x22c   :  { %v365_v38 = vmul.f32 %v644_v37, %v363_v36  ;;  %v372_v49 = vsub.f32 1.0, %v644_v37 }
 0x22e   :  { %367 = vrot.lane.b32.xlu0 %v365_v38, %s773_s1 }
 0x2a0   :  { %v368_v39 = vpop.permute.xlu0 %367 }
 0x2a1   :  { %v370_v40 = vadd.f32 %v368_v39, %v267_v30 }
 0x2a3   :  { %645 = vtanh.f32 %v370_v40 }
 0x2ad   :  { %v646_v47 = vpop.eup %645 }
 0x2ae   :  { %374 = vrot.lane.b32.xlu1 %v646_v47, %s774_s3 }
 0x2b2   :  { %378 = vrot.lane.b32.xlu1 %v100_v15, %s775_s4 }
 0x320   :  { %v375_v48 = vpop.permute.xlu1 %374 }
 0x321   :  { %v377_v51 = vmul.f32 %v375_v48, %v372_v49 }
 0x324   :  { %v379_v50 = vpop.permute.xlu1 %378 }
 0x325   :  { %v381_v52 = vmul.f32 %v644_v37, %v379_v50 }
 0x327   :  { %v382_v53 = vadd.f32 %v381_v52, %v377_v51 }
 0x329   :  { %395 = vrot.lane.b32.xlu0 %v382_v53, %s774_s3 }
 0x39b   :  { %v396_v54 = vpop.permute.xlu0 %395 }
 0x39c   :  { %521 = vst.msk [vmem:[%s974_s11] sm:$0xff] %vm196_vm2, %v396_v54  ;;  %601 = vmatmul.mubr.msk.f32.vlgmr.msra.gmra.mrb[2].mxu1 %vm196_vm2, %v396_v54  ;;  %s776_s11 = smov 112  }
 0x46f   :  { %v465_v2 = vpop.f32.mrb[2].mxu1 }
 0x470   :  { %v466_v5 = vadd.f32 %v540_v0, %v465_v2  ;;  %v602_v6 = vpop.f32.mrb[3].mxu1 }
 0x472   :  { %v506_v7 = vmul.f32 %v544_v3, %v466_v5  ;;  %v497_v8 = vmul.f32 %v543_v4, %v466_v5  ;;  %v493_v10 = vmul.f32 %v542_v9, %v466_v5 }
 0x474   :  { %508 = vrot.lane.b32.xlu0 %v506_v7, %s776_s11  ;;  %499 = vrot.lane.b32.xlu1 %v497_v8, %s777_s7 }
 0x4e6   :  { %v500_v11 = vpop.permute.xlu1 %499  ;;  %v509_v13 = vpop.permute.xlu0 %508 }
 0x4e7   :  { %v502_v12 = vadd.f32 %v500_v11, %v493_v10 }
 0x4e9   :  { %v511_v14 = vadd.f32 %v509_v13, %v502_v12 }
 0x4eb   :  { %v512_v15 = vmul.f32 0.5, %v511_v14 }
 0x4ed   :  { %514 = vrot.lane.b32.xlu1 %v512_v15, %s777_s7 }
 0x55f   :  { %v515_v16 = vpop.permute.xlu1 %514 }
 0x560   :  { %v517_v17 = vadd.f32 %v515_v16, %v466_v5 }
 0x562   :  { %519 = vst.msk [vmem:[%s973_s10] sm:$0xff] %vm518_vm9, %v517_v17 }
 0x563   :  { %530 = vsyncpa [#allocation3], 1 }
 0x564   :  { %531 = vsyncpa [#allocation5], 1 }
 0x565   :  { %532 = vsyncpa [#allocation8], 1 }

</bundles_post_ra>
